<compile_context>
chip_gen: v6e
topology: v6e:2x2x1
jax: 0.10.0
libtpu: 0.0.40
codegen_flags: <defaults>
</compile_context>

<pallas_src>
import functools

import jax
import jax.numpy as jnp
from jax.experimental import pallas as pl
from jax.experimental.pallas import tpu as pltpu


def _round_up(x, m):
    return (x + m - 1) // m * m


# ------------------------------------------------------------------
# Kernel 1: BN folding + per-tensor asymmetric fake-quant of weights
# ------------------------------------------------------------------
def fold_quant_kernel(w_ref, gamma_ref, beta_ref, mean_ref, var_ref,
                      qw_ref, bias_ref, *, weight_bit, eps):
    # w_ref : (KH*KW*IC, OC) f32, already in matmul-ready (hw,i -> o) layout.
    # bn params: (1, OC) f32.
    # Outputs: qw (KH*KW*IC, OC) in matmul dtype (bf16), bias (1, OC) f32.
    sf = gamma_ref[...] / jnp.sqrt(var_ref[...] + eps)            # (1, OC)
    sw = w_ref[...] * sf                                          # bcast over rows
    bias_ref[...] = (0.0 - mean_ref[...]) * sf + beta_ref[...]    # conv bias is None

    # per-tensor asymmetric fake quantization (signed, integral zero point)
    w_min = jnp.min(sw)
    w_max = jnp.max(sw)
    n_levels = float(2 ** weight_bit - 1)
    scale = n_levels / jnp.maximum(w_max - w_min, 1e-8)
    zero_point = jnp.round(scale * w_min) + 2.0 ** (weight_bit - 1)
    half = 2.0 ** (weight_bit - 1)
    q = jnp.clip(jnp.round(scale * sw - zero_point), -half, half - 1.0)
    qw_ref[...] = ((q + zero_point) / scale).astype(qw_ref.dtype)
    # TODO(synk): tile this kernel over OC with a two-pass min/max reduction for very
    #             large OC*IC*KH*KW weights (single whole-array block exceeds VMEM).


# ------------------------------------------------------------------
# Kernel 2: tiled direct 2-D convolution (stride supported, pad outside)
# ------------------------------------------------------------------
def conv2d_kernel(x_ref, w_ref, b_ref, o_ref, *, KH, KW, TH, OWp, SH, SW):
    # x_ref : (1, Hp, Wp, IC)      bf16 whole padded image (resident per batch n)
    # w_ref : (1, KH*KW, IC, TOC)  bf16 per-tap weight matrices for this OC tile
    # b_ref : (1, 1, TOC)          f32
    # o_ref : (1, TH, OWp, TOC)    f32 output tile
    t = pl.program_id(2)                       # output-row-tile index (innermost axis)
    row0 = t * (TH * SH)
    if (TH * SH) % 8 == 0:
        row0 = pl.multiple_of(row0, 8)

    toc = o_ref.shape[-1]
    # Register accumulator initialized with the broadcast bias: no zero-fill pass,
    # no per-tap VMEM read-modify-write, no epilogue bias add.
    acc = jnp.broadcast_to(b_ref[0], (TH * OWp, toc))
    for kh in range(KH):
        for kw in range(KW):
            rows = pl.ds(row0 + kh, TH) if SH == 1 else pl.ds(row0 + kh, TH, SH)
            cols = pl.ds(kw, OWp) if SW == 1 else pl.ds(kw, OWp, SW)
            patch = x_ref[0, rows, cols, :]                  # (TH, OWp, IC) bf16
            # OWp % 8 == 0, so this merge of (TH, OWp) is layout-free (no sublane repack)
            patch2d = patch.reshape(TH * OWp, patch.shape[-1])
            w_tap = w_ref[0, kh * KW + kw]                   # (IC, TOC) bf16
            acc = acc + jnp.dot(patch2d, w_tap,
                                preferred_element_type=jnp.float32)
    o_ref[...] = acc.reshape(o_ref.shape).astype(o_ref.dtype)
    # TODO(synk): for very small IC, fuse the KW taps into one matmul (K = KW*IC) by
    #             concatenating shifted patches along channels.


# ------------------------------------------------------------------
# Wrapper (layout plumbing only)
# ------------------------------------------------------------------
def quant_bn_conv2d(x_nchw, conv_weight_oihw, bn_gamma, bn_beta, bn_mean, bn_var,
                    *, weight_bit=8, stride=(1, 1), padding=(1, 1), eps=1e-5,
                    matmul_dtype=jnp.bfloat16):
    OC, IC, KH, KW = conv_weight_oihw.shape
    N, C, H, W = x_nchw.shape
    assert C == IC, "channel mismatch"
    SH, SW = stride
    PH, PW = padding

    # --- Kernel 1: fold BN + fake-quantize, emitted directly in matmul layout (bf16) ---
    w_hwio = jnp.transpose(conv_weight_oihw.astype(jnp.float32), (2, 3, 1, 0))
    w2d = w_hwio.reshape(KH * KW * IC, OC)
    g = bn_gamma.reshape(1, OC).astype(jnp.float32)
    b = bn_beta.reshape(1, OC).astype(jnp.float32)
    m = bn_mean.reshape(1, OC).astype(jnp.float32)
    v = bn_var.reshape(1, OC).astype(jnp.float32)
    qw2d, bias = pl.pallas_call(
        functools.partial(fold_quant_kernel, weight_bit=weight_bit, eps=eps),
        out_shape=(jax.ShapeDtypeStruct((KH * KW * IC, OC), matmul_dtype),
                   jax.ShapeDtypeStruct((1, OC), jnp.float32)),
    )(w2d, g, b, m, v)

    # --- output sizes / tiling ---
    Hp0, Wp0 = H + 2 * PH, W + 2 * PW
    OH = (Hp0 - KH) // SH + 1
    OW = (Wp0 - KW) // SW + 1

    OWp = _round_up(OW, 8)                 # layout-free in-kernel reshape
    OCp = _round_up(OC, 128)               # lane-dense output stores
    TOC = 256 if OCp % 256 == 0 else 128   # wider N tile for the 256-wide MXUs (v6e/v7x)
    n_oct = OCp // TOC
    target_m = (32 * 1024) // TOC          # keep the f32 register acc at <= 32 vregs
    TH = max(1, min(OH, target_m // OWp))  # no divisibility requirement on OH
    n_rt = pl.cdiv(OH, TH)
    OHp = n_rt * TH

    # --- weights / bias: OC pad + OC-tile layout (tiny wrapper passes, O(weights)) ---
    qw = qw2d.reshape(KH * KW, IC, OC)
    qw = jnp.pad(qw, ((0, 0), (0, 0), (0, OCp - OC)))
    qw_tiled = qw.reshape(KH * KW, IC, n_oct, TOC).transpose(2, 0, 1, 3)  # (n_oct,KH*KW,IC,TOC)
    bias_tiled = jnp.pad(bias, ((0, 0), (0, OCp - OC))).reshape(n_oct, 1, TOC)

    # --- activations: NCHW -> NHWC, cast to bf16, spatial pad only (IC NOT padded) ---
    x_nhwc = jnp.transpose(x_nchw, (0, 2, 3, 1)).astype(matmul_dtype)
    Hp = max(Hp0, (OHp - 1) * SH + KH)     # extra bottom rows for the padded row tiles
    Wp = max(Wp0, (OWp - 1) * SW + KW)     # extra right cols for the padded OW
    x_pad = jnp.pad(x_nhwc, ((0, 0), (PH, Hp - H - PH), (PW, Wp - W - PW), (0, 0)))

    # --- explicit VMEM budget (double-buffered blocks + accumulator/spill headroom) ---
    it = jnp.dtype(matmul_dtype).itemsize
    x_blk = Hp * Wp * IC * it
    w_blk = KH * KW * IC * TOC * it
    b_blk = TOC * 4
    o_blk = TH * OWp * TOC * 4
    needed = 2 * (x_blk + w_blk + b_blk + o_blk) + o_blk
    if needed > (44 << 20):
        # TODO(synk): window the x BlockSpec over output-row tiles (halo of KH-1 rows)
        #             instead of keeping the whole padded image resident per batch element.
        raise NotImplementedError("padded image too large for whole-image VMEM residency")
    vmem_limit = int(min(max(needed + (8 << 20), 32 << 20), 48 << 20))

    # --- grid: (batch, OC-tiles, row-tiles). Row-tile axis innermost so the weight/bias
    #     blocks (index = c) are not re-fetched every step; the x block (index = n) is
    #     fetched once per batch element. Only the batch axis is marked 'parallel' so a
    #     megacore split does not duplicate the resident image across TensorCores. ---
    out_padded = pl.pallas_call(
        functools.partial(conv2d_kernel, KH=KH, KW=KW, TH=TH, OWp=OWp, SH=SH, SW=SW),
        out_shape=jax.ShapeDtypeStruct((N, OHp, OWp, OCp), jnp.float32),
        grid=(N, n_oct, n_rt),
        in_specs=[
            pl.BlockSpec((1, Hp, Wp, IC), lambda n, c, t: (n, 0, 0, 0)),
            pl.BlockSpec((1, KH * KW, IC, TOC), lambda n, c, t: (c, 0, 0, 0)),
            pl.BlockSpec((1, 1, TOC), lambda n, c, t: (c, 0, 0)),
        ],
        out_specs=pl.BlockSpec((1, TH, OWp, TOC), lambda n, c, t: (n, t, 0, c)),
        compiler_params=pltpu.CompilerParams(
            dimension_semantics=("parallel", "arbitrary", "arbitrary"),
            vmem_limit_bytes=vmem_limit),
    )(x_pad, qw_tiled, bias_tiled)

    # Strip OH/OW/OC padding; back to NCHW (the module's interface).
    out = out_padded[:, :OH, :OW, :OC]
    return jnp.transpose(out, (0, 3, 1, 2))


# ------------------------------------------------------------------
# Pure-JAX reference (same math; bf16 matmul inputs, f32 accumulation)
# ------------------------------------------------------------------
def reference(x, w, g, beta, m, v, *, weight_bit=8, eps=1e-5,
              stride=(1, 1), padding=(1, 1), matmul_dtype=jnp.bfloat16):
    sf = g / jnp.sqrt(v + eps)
    sw = w * sf.reshape(-1, 1, 1, 1)
    bias = (0.0 - m) * sf + beta
    w_min, w_max = sw.min(), sw.max()
    n = float(2 ** weight_bit - 1)
    scale = n / jnp.maximum(w_max - w_min, 1e-8)
    zp = jnp.round(scale * w_min) + 2.0 ** (weight_bit - 1)
    half = 2.0 ** (weight_bit - 1)
    q = jnp.clip(jnp.round(scale * sw - zp), -half, half - 1.0)
    qw = (q + zp) / scale
    out = jax.lax.conv_general_dilated(
        x.astype(matmul_dtype), qw.astype(matmul_dtype), stride,
        [(padding[0], padding[0]), (padding[1], padding[1])],
        dimension_numbers=('NCHW', 'OIHW', 'NCHW'),
        preferred_element_type=jnp.float32)
    return out + bias.reshape(1, -1, 1, 1)


def _run_case(key, *, N, IC, H, W, OC, KH, KW, stride, padding, weight_bit=8):
    k_x, k_w, k_g, k_b, k_m, k_v = jax.random.split(key, 6)
    x = jax.random.normal(k_x, (N, IC, H, W), jnp.float32)
    conv_w = jax.random.normal(k_w, (OC, IC, KH, KW), jnp.float32) * 0.1
    g = jax.random.uniform(k_g, (OC,), jnp.float32, 0.5, 1.5)
    b = jax.random.normal(k_b, (OC,), jnp.float32) * 0.1
    m = jax.random.normal(k_m, (OC,), jnp.float32) * 0.1
    v = jax.random.uniform(k_v, (OC,), jnp.float32, 0.5, 1.5)

    out = quant_bn_conv2d(x, conv_w, g, b, m, v, weight_bit=weight_bit,
                          stride=stride, padding=padding)
    out = jax.block_until_ready(out)
    ref = reference(x, conv_w, g, b, m, v, weight_bit=weight_bit,
                    stride=stride, padding=padding)
    assert out.shape == ref.shape, (out.shape, ref.shape)
    max_err = float(jnp.max(jnp.abs(out - ref)))
    assert jnp.allclose(out, ref, rtol=2e-3, atol=2e-3), f"max abs err {max_err}"
    return max_err


if __name__ == "__main__":
    key = jax.random.PRNGKey(0)
    k1, k2 = jax.random.split(key)

    # case 1: small stem-like layer (IC=4), tile-friendly spatial size
    _run_case(k1, N=2, IC=4, H=16, W=16, OC=8, KH=3, KW=3,
              stride=(1, 1), padding=(1, 1))

    # case 2: odd spatial size (OW padded to a multiple of 8, OH not divisible by TH)
    #         and OC > 128 (multiple OC tiles + OC padding)
    _run_case(k2, N=1, IC=3, H=35, W=15, OC=300, KH=3, KW=3,
              stride=(1, 1), padding=(1, 1))

    print("KERNEL_OK")
</pallas_src>

<mosaic_0001>
module attributes {stable_mosaic.version = 11 : i64} {
  func.func @fold_quant_kernel(%arg0: memref<36x8xf32, #tpu.memory_space<vmem>>, %arg1: memref<1x8xf32, #tpu.memory_space<vmem>>, %arg2: memref<1x8xf32, #tpu.memory_space<vmem>>, %arg3: memref<1x8xf32, #tpu.memory_space<vmem>>, %arg4: memref<1x8xf32, #tpu.memory_space<vmem>>, %arg5: memref<36x8xbf16, #tpu.memory_space<vmem>>, %arg6: memref<1x8xf32, #tpu.memory_space<vmem>>) attributes {dimension_semantics = [], scalar_prefetch = 0 : i64, scratch_operands = 0 : i64, tpu.core_type = #tpu.core_type<tc>} {
    %c0 = arith.constant 0 : index
    %c0_0 = arith.constant 0 : index
    %0 = vector.load %arg1[%c0, %c0_0] : memref<1x8xf32, #tpu.memory_space<vmem>>, vector<1x8xf32>
    %c0_1 = arith.constant 0 : index
    %c0_2 = arith.constant 0 : index
    %1 = vector.load %arg4[%c0_1, %c0_2] : memref<1x8xf32, #tpu.memory_space<vmem>>, vector<1x8xf32>
    %cst = arith.constant 9.99999974E-6 : f32
    %2 = vector.broadcast %cst : f32 to vector<1x8xf32>
    %3 = arith.addf %1, %2 : vector<1x8xf32>
    %4 = math.sqrt %3 : vector<1x8xf32>
    %5 = arith.divf %0, %4 : vector<1x8xf32>
    %c0_3 = arith.constant 0 : index
    %c0_4 = arith.constant 0 : index
    %6 = vector.load %arg0[%c0_3, %c0_4] : memref<36x8xf32, #tpu.memory_space<vmem>>, vector<36x8xf32>
    %7 = vector.broadcast %5 : vector<1x8xf32> to vector<36x8xf32>
    %8 = arith.mulf %6, %7 : vector<36x8xf32>
    %c0_5 = arith.constant 0 : index
    %c0_6 = arith.constant 0 : index
    %9 = vector.load %arg3[%c0_5, %c0_6] : memref<1x8xf32, #tpu.memory_space<vmem>>, vector<1x8xf32>
    %cst_7 = arith.constant 0.000000e+00 : f32
    %10 = vector.broadcast %cst_7 : f32 to vector<1x8xf32>
    %11 = arith.subf %10, %9 : vector<1x8xf32>
    %12 = arith.mulf %11, %5 : vector<1x8xf32>
    %c0_8 = arith.constant 0 : index
    %c0_9 = arith.constant 0 : index
    %13 = vector.load %arg2[%c0_8, %c0_9] : memref<1x8xf32, #tpu.memory_space<vmem>>, vector<1x8xf32>
    %14 = arith.addf %12, %13 : vector<1x8xf32>
    %c0_10 = arith.constant 0 : index
    %c0_11 = arith.constant 0 : index
    %15 = vector.load %arg6[%c0_10, %c0_11] : memref<1x8xf32, #tpu.memory_space<vmem>>, vector<1x8xf32>
    tpu.vector_store %arg6[%c0_10, %c0_11], %14 {strides = array<i32>} : memref<1x8xf32, #tpu.memory_space<vmem>>, vector<1x8xf32>,
    %16 = vector.shape_cast %8 : vector<36x8xf32> to vector<1x36x8xf32>
    %cst_12 = arith.constant dense<0x7F800000> : vector<1xf32>
    %17 = vector.multi_reduction <minimumf>, %16, %cst_12 [1, 2] : vector<1x36x8xf32> to vector<1xf32>
    %18 = vector.shape_cast %17 : vector<1xf32> to vector<1x1x1xf32>
    %19 = vector.extract %18[0, 0, 0] : f32 from vector<1x1x1xf32>
    %20 = vector.shape_cast %8 : vector<36x8xf32> to vector<1x36x8xf32>
    %cst_13 = arith.constant dense<0xFF800000> : vector<1xf32>
    %21 = vector.multi_reduction <maximumf>, %20, %cst_13 [1, 2] : vector<1x36x8xf32> to vector<1xf32>
    %22 = vector.shape_cast %21 : vector<1xf32> to vector<1x1x1xf32>
    %23 = vector.extract %22[0, 0, 0] : f32 from vector<1x1x1xf32>
    %24 = arith.subf %23, %19 : f32
    %cst_14 = arith.constant 9.99999993E-9 : f32
    %25 = arith.maximumf %24, %cst_14 : f32
    %cst_15 = arith.constant 2.550000e+02 : f32
    %26 = arith.divf %cst_15, %25 : f32
    %27 = arith.mulf %26, %19 : f32
    %28 = math.roundeven %27 : f32
    %cst_16 = arith.constant 1.280000e+02 : f32
    %29 = arith.addf %28, %cst_16 : f32
    %30 = vector.broadcast %26 : f32 to vector<36x8xf32>
    %31 = arith.mulf %30, %8 : vector<36x8xf32>
    %32 = vector.broadcast %29 : f32 to vector<36x8xf32>
    %33 = arith.subf %31, %32 : vector<36x8xf32>
    %34 = math.roundeven %33 : vector<36x8xf32>
    %cst_17 = arith.constant -1.280000e+02 : f32
    %cst_18 = arith.constant 1.270000e+02 : f32
    %35 = vector.broadcast %cst_17 : f32 to vector<36x8xf32>
    %36 = arith.maximumf %35, %34 : vector<36x8xf32>
    %37 = vector.broadcast %cst_18 : f32 to vector<36x8xf32>
    %38 = arith.minimumf %37, %36 : vector<36x8xf32>
    %39 = vector.broadcast %29 : f32 to vector<36x8xf32>
    %40 = arith.addf %38, %39 : vector<36x8xf32>
    %41 = vector.broadcast %26 : f32 to vector<36x8xf32>
    %42 = arith.divf %40, %41 : vector<36x8xf32>
    %43 = arith.truncf %42 : vector<36x8xf32> to vector<36x8xbf16>
    %c0_19 = arith.constant 0 : index
    %c0_20 = arith.constant 0 : index
    %44 = vector.load %arg5[%c0_19, %c0_20] : memref<36x8xbf16, #tpu.memory_space<vmem>>, vector<36x8xbf16>
    tpu.vector_store %arg5[%c0_19, %c0_20], %43 {strides = array<i32>} : memref<36x8xbf16, #tpu.memory_space<vmem>>, vector<36x8xbf16>,
    return
  }
}

</mosaic_0001>

<bundles_post_ra>
// kernel: tpu_custom_call.1
= control target key start
LH: loop header
LB: loop body
LE: loop exit
PB: predicated region body
PF: predicated region fallthrough
CT: control target
= control target key end

     0   :  { %s434_s0 = inlined_call_operand.vmem [shape: f32[36,8], index: 0, kind: input, shape index: {}]   ;;  %s435_s1 = inlined_call_operand.vmem [shape: f32[1,8], index: 1, kind: input, shape index: {}]   ;;  %s436_s2 = inlined_call_operand.vmem [shape: f32[1,8], index: 2, kind: input, shape index: {}]   ;;  %s437_s3 = inlined_call_operand.vmem [shape: f32[1,8], index: 3, kind: input, shape index: {}]   ;;  %s438_s4 = inlined_call_operand.vmem [shape: f32[1,8], index: 4, kind: input, shape index: {}]   ;;  %s439_s5 = inlined_call_operand.vmem [shape: bf16[36,8], index: 5, kind: output, shape index: {0}]   ;;  %s440_s6 = inlined_call_operand.hbm [shape: f32[1,8], index: 6, kind: output, shape index: {1}]  }
   0x1   :  { %v24_v0 = vld [vmem:[%s438_s4] sm:$0x1] }
   0x2   :  { %v25_v1 = vadd.f32 1e-05, %v24_v0 }
   0x3   :  { %12 = vsyncpa [#allocation3], 0  ;;  %v41_v7 = vlaneseq  ;;  %v23_v9 = vld [vmem:[%s435_s1] sm:$0x1]  ;;  %v36_v14 = vld [vmem:[%s434_s0 + $0x8] sm:$0xff]  ;;  %vm58_vm2 = vcmask 64512  }
   0x4   :  { %253 = vrsqrt.f32 %v25_v1  ;;  %vm28_vm0 = vcmp.eq.f32.partialorder %v25_v1, inf  ;;  %v31_v3 = vand.u32 2147483648, %v25_v1  ;;  %vm30_vm1 = vcmp.eq.f32.partialorder %v25_v1, 0.0  ;;  %v35_v13 = vld [vmem:[%s434_s0] sm:$0xff]  ;;  %v37_v15 = vld [vmem:[%s434_s0 + $0x10] sm:$0xff]  ;;  %v38_v16 = vld [vmem:[%s434_s0 + $0x18] sm:$0xff] }
   0x5   :  { %v42_v8 = vshrl.u32 %v41_v7, 7  ;;  %v39_v17 = vld [vmem:[%s434_s0 + $0x20] sm:$0xf]  ;;  %vm63_vm3 = vcmask 60416   ;;  %vm56_vm4 = vcmask 57344   ;;  %s283_s12 = smov [#allocation2]  }
   0x6   :  { %v51_v56 = vld [vmem:[%s437_s3] sm:$0x1]  ;;  %s185_s13 = sshll.u32 %s283_s12, 4  ;;  %s186_s13 = int_to_ptr.vmem [resolvable:$true] %s185_s13 }
   0x7   :  { %v43_v10 = vsub.s32 0, %v42_v8  ;;  %v52_v57 = vsub.f32 0.0, %v51_v56  ;;  %v54_v59 = vld [vmem:[%s436_s2] sm:$0x1]  ;;  %s261_s14 = scalar_lea.vmem %s186_s13, 16  ;;  %s265_s15 = scalar_lea.vmem %s186_s13, 32 }
   0x8   :  { %p262_p0 = scmp.ne.s32.totalorder %s186_s13, %s261_s14  ;;  %p266_p1 = scmp.lt.s32.totalorder %s186_s13, %s186_s13 }
   0x9   :  { %p267_p2 = scmp.lt.s32.totalorder %s265_s15, %s261_s14 }
   0xb   :  { %p268_p3 = por %p267_p2, %p266_p1 }
   0xd   :  { %p269_p4 = pnand %p268_p3, %p262_p0 }
  0x11   :  { %v254_v2 = vpop.eup %253 }
  0x12   :  { %v27_v4 = vmul.f32 %v254_v2, %v25_v1 }
  0x14   :  { %v29_v5 = vsel %vm28_vm0, %v25_v1, %v27_v4 }
  0x15   :  { %v32_v6 = vsel %vm30_vm1, %v31_v3, %v29_v5 }
  0x16   :  { %255 = vrcp.f32 %v32_v6 }
  0x23   :  { %v256_v11 = vpop.eup %255 }
  0x24   :  { %v34_v12 = vmul.f32 %v256_v11, %v23_v9 }
  0x26   :  { %v44_v18 = vrot.slane %v34_v12, %v43_v10  ;;  %v53_v58 = vmul.f32 %v52_v57, %v34_v12 }
  0x28   :  { %v341_v19 = vmul.f32 %v44_v18, %v35_v13  ;;  %v343_v20 = vmul.f32 %v44_v18, %v36_v14  ;;  %v345_v21 = vmul.f32 %v44_v18, %v37_v15  ;;  %v347_v22 = vmul.f32 %v44_v18, %v38_v16 }
  0x29   :  { %v349_v23 = vmul.f32 %v44_v18, %v39_v17  ;;  %v55_v60 = vadd.f32 %v54_v59, %v53_v58 }
  0x2a   :  { %v59_v24 = vsel %vm58_vm2, %v341_v19, inf  ;;  %v60_v25 = vsel %vm58_vm2, %v343_v20, inf  ;;  %v61_v26 = vsel %vm58_vm2, %v345_v21, inf  ;;  %v62_v27 = vsel %vm58_vm2, %v347_v22, inf }
  0x2b   :  { %v64_v28 = vsel %vm63_vm3, %v349_v23, inf  ;;  %v67_v29 = vmin.f32 %v61_v26, %v62_v27  ;;  %v78_v30 = vsel %vm58_vm2, %v341_v19, -inf  ;;  %v79_v31 = vsel %vm58_vm2, %v343_v20, -inf  ;;  %57 = vst.msk [vmem:[#allocation2] sm:$0x1] %vm56_vm4, %v55_v60 }
  0x2c   :  { %v65_v32 = vmin.f32 %v59_v24, %v64_v28  ;;  %v80_v33 = vsel %vm58_vm2, %v345_v21, -inf  ;;  %v81_v34 = vsel %vm58_vm2, %v347_v22, -inf  ;;  %v82_v35 = vsel %vm63_vm3, %v349_v23, -inf }
  0x2d   :  { %v83_v36 = vmax.f32 %v78_v30, %v82_v35  ;;  %v85_v38 = vmax.f32 %v80_v33, %v81_v34 }
  0x2e   :  { %v66_v37 = vmin.f32 %v65_v32, %v60_v25 }
  0x2f   :  { %v84_v39 = vmax.f32 %v83_v36, %v79_v31 }
  0x30   :  { %v68_v40 = vmin.f32 %v66_v37, %v67_v29 }
  0x31   :  { %v86_v41 = vmax.f32 %v84_v39, %v85_v38 }
  0x32   :  { %69 = vmin.xlane.f32.xlu0 %v68_v40 }
  0x36   :  { %87 = vmax.xlane.f32.xlu0 %v86_v41 }
  0xbb   :  { %v70_v42 = vpop.xlane.xlu0 %69 }
  0xbc   :  { %v71_v43 = vrot.slane %v70_v42, 4 }
  0xbe   :  { %v72_v44 = vmin.f32 %v70_v42, %v71_v43 }
  0xbf   :  { %v88_v45 = vpop.xlane.xlu0 %87 }
  0xc0   :  { %v73_v46 = vrot.slane %v72_v44, 2  ;;  %v89_v47 = vrot.slane %v88_v45, 4 }
  0xc2   :  { %v90_v48 = vmax.f32 %v88_v45, %v89_v47  ;;  %v74_v49 = vmin.f32 %v72_v44, %v73_v46 }
  0xc4   :  { %v91_v50 = vrot.slane %v90_v48, 2  ;;  %v75_v51 = vrot.slane %v74_v49, 1 }
  0xc6   :  { %v92_v52 = vmax.f32 %v90_v48, %v91_v50  ;;  %v76_v53 = vmin.f32 %v74_v49, %v75_v51 }
  0xc8   :  { %205 = vpush %v76_v53  ;;  %v93_v54 = vrot.slane %v92_v52, 1 }
  0xca   :  { %v94_v55 = vmax.f32 %v92_v52, %v93_v54 }
  0xcc   :  { %207 = vpush %v94_v55 }
  0xcd   :  { %272 = shalt.err (!%p269_p4)
}
  0xce   :  { %188 = dma.vmem_to_hbm [thread:$0]  %s186_s13, 16, %s440_s6, [#allocation3]   ;;  %vm175_vm10 = vcmask 58368  }
  0xcf   :  { %s284_s19 = smov 1e-08  }
  0xf9   :  { %s206_s17 = spop %205 }
  0xfd   :  { %s208_s2 = spop %207 }
  0xfe   :  { %s96_s18 = ssub.f32 %s208_s2, %s206_s17 }
 0x100   :  { %s97_s20 = smax.f32 %s284_s19, %s96_s18 }
 0x101   :  { %v98_v61 = vstv %s97_s20 }
 0x102   :  { %257 = vrcp.f32 %v98_v61 }
 0x10f   :  { %v258_v62 = vpop.eup %257 }
 0x110   :  { %209 = vpush %v258_v62 }
 0x141   :  { %s210_s21 = spop %209 }
 0x142   :  { %s101_s22 = smul.f32 255.0, %s210_s21 }
 0x144   :  { %s102_s23 = smul.f32 %s206_s17, %s101_s22  ;;  %v112_v63 = vstv %s101_s22 }
 0x145   :  { %v113_v0 = vmul.f32 %v112_v63, %v341_v19  ;;  %v114_v1 = vmul.f32 %v112_v63, %v343_v20  ;;  %v115_v2 = vmul.f32 %v112_v63, %v345_v21  ;;  %v116_v4 = vmul.f32 %v112_v63, %v347_v22 }
 0x146   :  { %s103_s24 = scvt.f32.s32 %s102_s23  ;;  %s108_s4 = sand.u32 2147483647, %s102_s23  ;;  %v117_v8 = vmul.f32 %v112_v63, %v349_v23  ;;  %259 = vrcp.f32 %v112_v63 }
 0x147   :  { %s106_s26 = sand.u32 2147483648, %s102_s23  ;;  %p109_p5 = scmp.lt.f32.partialorder %s108_s4, 2.1474836e+09 }
 0x148   :  { %s104_s25 = scvt.s32.f32 %s103_s24 }
 0x14a   :  { %s105_s27 = sand.u32 2147483647, %s104_s25 }
 0x14b   :  { %s107_s28 = sor.u32 %s106_s26, %s105_s27 }
 0x14c   :  { %s448_s28 = smov (!%p109_p5, %s107_s28), %s102_s23 }
 0x14d   :  { %s111_s6 = sadd.f32 128.0, %s448_s28 }
 0x14f   :  { %v383_v3 = vstv %s111_s6 }
 0x150   :  { %v119_v5 = vsub.f32 %v113_v0, %v383_v3  ;;  %v120_v6 = vsub.f32 %v114_v1, %v383_v3  ;;  %v121_v7 = vsub.f32 %v115_v2, %v383_v3  ;;  %v122_v9 = vsub.f32 %v116_v4, %v383_v3 }
 0x151   :  { %v123_v13 = vsub.f32 %v117_v8, %v383_v3 }
 0x152   :  { %v211_v10 = vand.u32 2147483647, %v119_v5  ;;  %v213_v11 = vcvt.f32.s32 %v119_v5  ;;  %v219_v12 = vand.u32 2147483647, %v120_v6  ;;  %v221_v14 = vcvt.f32.s32 %v120_v6 }
 0x153   :  { %v229_v15 = vcvt.f32.s32 %v121_v7  ;;  %v227_v17 = vand.u32 2147483647, %v121_v7  ;;  %v216_v18 = vand.u32 2147483648, %v119_v5  ;;  %v224_v20 = vand.u32 2147483648, %v120_v6  ;;  %v260_v57 = vpop.eup %259 }
 0x154   :  { %v214_v16 = vcvt.s32.f32 %v213_v11  ;;  %v222_v19 = vcvt.s32.f32 %v221_v14  ;;  %vm392_vm5 = vcmp.lt.f32.partialorder %v211_v10, 8388608.0  ;;  %vm396_vm6 = vcmp.lt.f32.partialorder %v219_v12, 8388608.0 }
 0x155   :  { %v230_v21 = vcvt.s32.f32 %v229_v15  ;;  %v237_v25 = vcvt.f32.s32 %v122_v9  ;;  %v232_v28 = vand.u32 2147483648, %v121_v7  ;;  %v245_v29 = vcvt.f32.s32 %v123_v13 }
 0x156   :  { %v215_v23 = vand.u32 2147483647, %v214_v16  ;;  %v223_v26 = vand.u32 2147483647, %v222_v19  ;;  %vm400_vm7 = vcmp.lt.f32.partialorder %v227_v17, 8388608.0  ;;  %v240_v36 = vand.u32 2147483648, %v122_v9 }
 0x157   :  { %v231_v27 = vand.u32 2147483647, %v230_v21  ;;  %v235_v32 = vand.u32 2147483647, %v122_v9  ;;  %v238_v33 = vcvt.s32.f32 %v237_v25  ;;  %v246_v37 = vcvt.s32.f32 %v245_v29 }
 0x158   :  { %v217_v30 = vor.u32 %v216_v18, %v215_v23  ;;  %v225_v34 = vor.u32 %v224_v20, %v223_v26  ;;  %v243_v40 = vand.u32 2147483647, %v123_v13  ;;  %v248_v41 = vand.u32 2147483648, %v123_v13 }
 0x159   :  { %v233_v35 = vor.u32 %v232_v28, %v231_v27  ;;  %v239_v39 = vand.u32 2147483647, %v238_v33  ;;  %v247_v44 = vand.u32 2147483647, %v246_v37  ;;  %vm236_vm8 = vcmp.lt.f32.partialorder %v235_v32, 8388608.0 }
 0x15a   :  { %v218_v38 = vsel %vm392_vm5, %v217_v30, %v119_v5  ;;  %v226_v42 = vsel %vm396_vm6, %v225_v34, %v120_v6  ;;  %vm244_vm9 = vcmp.lt.f32.partialorder %v243_v40, 8388608.0 }
 0x15b   :  { %v234_v43 = vsel %vm400_vm7, %v233_v35, %v121_v7  ;;  %v129_v45 = vmax.f32 %v218_v38, -128.0  ;;  %v241_v46 = vor.u32 %v240_v36, %v239_v39  ;;  %v130_v47 = vmax.f32 %v226_v42, -128.0 }
 0x15c   :  { %v131_v48 = vmax.f32 %v234_v43, -128.0  ;;  %v249_v49 = vor.u32 %v248_v41, %v247_v44 }
 0x15d   :  { %v134_v50 = vmin.f32 %v129_v45, 127.0  ;;  %v242_v51 = vsel %vm236_vm8, %v241_v46, %v122_v9  ;;  %v135_v52 = vmin.f32 %v130_v47, 127.0 }
 0x15e   :  { %v136_v53 = vmin.f32 %v131_v48, 127.0  ;;  %v250_v54 = vsel %vm244_vm9, %v249_v49, %v123_v13  ;;  %v132_v55 = vmax.f32 %v242_v51, -128.0 }
 0x15f   :  { %v139_v56 = vadd.f32 %v134_v50, %v383_v3  ;;  %v133_v58 = vmax.f32 %v250_v54, -128.0  ;;  %v140_v59 = vadd.f32 %v135_v52, %v383_v3 }
 0x160   :  { %v141_v60 = vadd.f32 %v136_v53, %v383_v3  ;;  %v137_v61 = vmin.f32 %v132_v55, 127.0 }
 0x161   :  { %v145_v62 = vmul.f32 %v260_v57, %v139_v56  ;;  %v138_v63 = vmin.f32 %v133_v58, 127.0  ;;  %v146_v0 = vmul.f32 %v260_v57, %v140_v59 }
 0x162   :  { %v147_v1 = vmul.f32 %v260_v57, %v141_v60  ;;  %v142_v2 = vadd.f32 %v137_v61, %v383_v3 }
 0x163   :  { %v200_v4 = vpack.c.bf16 %v145_v62, %v145_v62  ;;  %v143_v5 = vadd.f32 %v138_v63, %v383_v3  ;;  %v201_v6 = vpack.c.bf16 %v146_v0, %v146_v0 }
 0x164   :  { %v202_v7 = vpack.c.bf16 %v147_v1, %v147_v1  ;;  %v148_v8 = vmul.f32 %v260_v57, %v142_v2 }
 0x165   :  { %171 = vst.msk [vmem:[%s439_s5] sm:$0xf] %vm63_vm3, %v200_v4  ;;  %v149_v9 = vmul.f32 %v260_v57, %v143_v5  ;;  %172 = vst.msk [vmem:[%s439_s5 + $0x4] sm:$0xf] %vm63_vm3, %v201_v6 }
 0x166   :  { %173 = vst.msk [vmem:[%s439_s5 + $0x8] sm:$0xf] %vm63_vm3, %v202_v7  ;;  %v203_v3 = vpack.c.bf16 %v148_v8, %v148_v8 }
 0x167   :  { %v204_v10 = vpack.c.bf16 %v149_v9, %v149_v9 }
 0x168   :  { %174 = vst.msk [vmem:[%s439_s5 + $0xc] sm:$0xf] %vm63_vm3, %v203_v3 }
 0x169   :  { %176 = vst.msk [vmem:[%s439_s5 + $0x10] sm:$0x3] %vm175_vm10, %v204_v10 }
 0x16a   :  { %281 = dma.done.wait [#allocation3], 16  }
 0x16b   :  { %282 = vsyncadd [#allocation3], 4294967280 }
 0x16c   :  { %194 = vsyncpa [#allocation3], 1 }

</bundles_post_ra>
